<compile_context>
chip_gen: v6e
topology: v6e:2x2x1
jax: 0.10.0
libtpu: 0.0.40
codegen_flags: <defaults>
</compile_context>

<pallas_src>
from functools import partial

import numpy as np
import jax
import jax.numpy as jnp
from jax.experimental import pallas as pl
from jax.experimental.pallas import tpu as pltpu


def _round_up(n, m):
    return (n + m - 1) // m * m


def _wfm_kernel(x_ref, k_ref, o_ref):
    # x_ref: (TN, pack*P_pad) window tile of one channel group (bf16 or f32)
    # k_ref: (pack*P_pad, pack*P_pad) block-diagonal folded frequency operator
    # o_ref: (TN, pack*P_pad) output tile in compute dtype (lane-dense stores)
    o_ref[...] = jnp.dot(
        x_ref[...], k_ref[...], preferred_element_type=jnp.float32
    ).astype(o_ref.dtype)


def build_wfm_operator(complex_weight, window_size, pack=2, dtype=jnp.bfloat16):
    """Fold rfft2(ortho) -> complex multiply -> irfft2(ortho) into a real
    per-channel (P, P) operator, then pack `pack` channels into a
    block-diagonal (pack*P_pad, pack*P_pad) operator per channel group,
    zero-padding P -> P_pad so pack*P_pad is a multiple of 128 lanes.

    Returns (C_pad // pack, pack*P_pad, pack*P_pad).  Build ONCE per weight,
    in the dtype you will stream with (no per-call cast).
    """
    ws = window_size
    P = ws * ws
    assert pack >= 1 and 128 % pack == 0, "pack must divide 128"
    # lane-density guard: unmasked 128-wide stores need pack*P_pad % 128 == 0
    P_pad = P if (pack * P) % 128 == 0 else _round_up(P, max(8, 128 // pack))

    Wc = complex_weight[..., 0] + 1j * complex_weight[..., 1]   # (ws, ws//2+1, C)
    C = Wc.shape[-1]

    basis = jnp.eye(P, dtype=jnp.float32).reshape(P, ws, ws)    # delta windows
    F = jnp.fft.rfft2(basis, norm="ortho")                      # (P, ws, ws//2+1)
    prod = F[:, :, :, None] * Wc[None, :, :, :]                 # (P, ws, ws//2+1, C)
    col = jnp.fft.irfft2(jnp.moveaxis(prod, -1, 1),
                         s=(ws, ws), norm="ortho")              # (P_in, C, ws, ws)
    K = jnp.transpose(col.reshape(P, C, P), (1, 0, 2))          # (C, P_in, P_out)
    K = K.astype(jnp.float32)

    if P_pad != P:
        K = jnp.pad(K, ((0, 0), (0, P_pad - P), (0, P_pad - P)))

    # pad channels to a multiple of `pack`, then build block-diagonal groups
    C_pad = _round_up(C, pack)
    if C_pad != C:
        K = jnp.pad(K, ((0, C_pad - C), (0, 0), (0, 0)))
    Cp = C_pad // pack
    Kr = K.reshape(Cp, pack, P_pad, P_pad)
    eye = jnp.eye(pack, dtype=K.dtype)
    # K_pack[cp, k*P_pad+i, l*P_pad+j] = K[cp*pack+k, i, j] * (k == l)
    Kp = jnp.einsum("ckij,kl->ckilj", Kr, eye).reshape(
        Cp, pack * P_pad, pack * P_pad)
    return Kp.astype(dtype)


@partial(jax.jit, static_argnames=(
    "H", "W", "window_size", "pack", "block_windows", "compute_dtype"))
def window_frequency_modulation(x, k_packed, *, H, W, window_size,
                                pack=2, block_windows=4096,
                                compute_dtype=jnp.bfloat16):
    """x: (B, L, C) with L == H*W (matches the PyTorch module).  k_packed is
    the precomputed operator from build_wfm_operator, already in
    `compute_dtype`.  Output is f32 (the module computes in f32), (B, L, C).

    block_windows: window-tile sublane count; 4096 is a good default on
    v5e/v6e, use 8192 on v7x (still < 10 MiB/step of double-buffered VMEM)."""
    B, L, C = x.shape
    ws = window_size
    assert H * W == L and H % ws == 0 and W % ws == 0
    nW1, nW2 = H // ws, W // ws
    P = ws * ws
    N = B * nW1 * nW2
    C_pad = _round_up(C, pack)
    Cp = C_pad // pack

    PP = k_packed.shape[-1]
    P_pad = PP // pack
    assert k_packed.shape == (Cp, PP, PP) and P_pad >= P
    if k_packed.dtype != compute_dtype:
        raise ValueError("k_packed must be pre-built in compute_dtype "
                         f"({k_packed.dtype} vs {compute_dtype})")

    # ---- relayout: b (w1 p1) (w2 p2) c -> (cp, b*w1*w2, pack*P_pad) ----
    # cast to compute dtype in the same pass (fused by XLA with the transpose)
    xf = x.reshape(B, nW1, ws, nW2, ws, C).astype(compute_dtype)
    if C_pad != C:
        xf = jnp.pad(xf, ((0, 0),) * 5 + ((0, C_pad - C),))
    xf = xf.reshape(B, nW1, ws, nW2, ws, Cp, pack)
    xw = jnp.transpose(xf, (5, 0, 1, 3, 6, 2, 4))   # (Cp,B,w1,w2,pack,p1,p2)
    xw = xw.reshape(Cp, N, pack, P)
    if P_pad != P:
        xw = jnp.pad(xw, ((0, 0), (0, 0), (0, 0), (0, P_pad - P)))
    xw = xw.reshape(Cp, N, PP)

    # window-tile size: big enough that the ~0.35us per-grid-step overhead is
    # amortized; sublane quantum 16 for 2-byte dtypes, 8 for f32.
    sub = 16 if jnp.dtype(compute_dtype).itemsize == 2 else 8
    TN = min(_round_up(block_windows, sub), _round_up(N, sub))
    # keep >=2 independent grid steps so v7x can shard across its 2 TCs
    if Cp == 1 and N > sub and _round_up(N, TN) // TN < 2:
        TN = _round_up((N + 1) // 2, sub)
    N_pad = _round_up(N, TN)
    if N_pad != N:
        xw = jnp.pad(xw, ((0, 0), (0, N_pad - N), (0, 0)))

    # Per-step VMEM (TN=4096, pack=2, bf16 in/out):
    #   x 2*TN*PP*2B + out 2*TN*PP*2B + K 2*PP*PP*2B ~= 4.1 MiB  (8.2 at 8192)
    # comfortably inside the 32 MiB scoped limit on v5e/v6e/v7x.
    out = pl.pallas_call(
        _wfm_kernel,
        out_shape=jax.ShapeDtypeStruct((Cp, N_pad, PP), compute_dtype),
        grid_spec=pltpu.PrefetchScalarGridSpec(
            num_scalar_prefetch=0,
            # channel-group outer, window-tile inner: K's block index is fixed
            # across the inner loop, so it stays resident in VMEM.
            grid=(Cp, N_pad // TN),
            in_specs=[
                pl.BlockSpec((pl.Squeezed(), TN, PP), lambda c, n: (c, n, 0)),
                pl.BlockSpec((pl.Squeezed(), PP, PP), lambda c, n: (c, 0, 0)),
            ],
            out_specs=pl.BlockSpec((pl.Squeezed(), TN, PP),
                                   lambda c, n: (c, n, 0)),
        ),
        compiler_params=pltpu.CompilerParams(
            dimension_semantics=("parallel", "parallel"),  # v7x: both TCs
            vmem_limit_bytes=32 * 1024 * 1024,             # v5e default is 16
        ),
    )(xw, k_packed)

    # ---- inverse relayout: (cp, n, pack*P_pad) -> b (w1 p1) (w2 p2) c ----
    out = out[:, :N, :].reshape(Cp, N, pack, P_pad)
    if P_pad != P:
        out = out[..., :P]
    out = out.reshape(Cp, B, nW1, nW2, pack, ws, ws)
    # f32 cast fused into the transpose (read bf16, write f32 once)
    out = jnp.transpose(out, (1, 2, 5, 3, 6, 0, 4)).astype(jnp.float32)
    out = out.reshape(B, H, W, C_pad)
    return out[..., :C].reshape(B, L, C)


def reference_fft(x, H, W_sp, complex_weight, ws):
    """Pure-JAX reference mirroring the PyTorch forward exactly."""
    B, L, C = x.shape
    nW1, nW2 = H // ws, W_sp // ws
    xf = x.astype(jnp.float32).reshape(B, H, W_sp, C)
    xw = xf.reshape(B, nW1, ws, nW2, ws, C).transpose(0, 1, 3, 2, 4, 5)
    Xf = jnp.fft.rfft2(xw, axes=(3, 4), norm="ortho")
    Wc = complex_weight[..., 0] + 1j * complex_weight[..., 1]  # (ws, ws//2+1, C)
    Xf = Xf * Wc
    y = jnp.fft.irfft2(Xf, s=(ws, ws), axes=(3, 4), norm="ortho")
    y = y.transpose(0, 1, 3, 2, 4, 5).reshape(B, H, W_sp, C)
    return y.reshape(B, L, C)


if __name__ == "__main__":
    key = jax.random.PRNGKey(0)
    B, C, ws = 2, 4, 8
    H = W_sp = 16
    L = H * W_sp

    k1, k2, k3 = jax.random.split(key, 3)
    x = jax.random.normal(k1, (B, L, C), dtype=jnp.float32)

    # Module __init__ uses (ones, zeros) -> identity modulation; keep the same
    # shape (ws, ws//2+1, dim, 2) but add a small deterministic perturbation so
    # the frequency modulation is non-trivial and the check is meaningful.
    cw_real = 1.0 + 0.1 * jax.random.normal(k2, (ws, ws // 2 + 1, C, 1),
                                            jnp.float32)
    cw_imag = 0.1 * jax.random.normal(k3, (ws, ws // 2 + 1, C, 1), jnp.float32)
    complex_weight = jnp.concatenate([cw_real, cw_imag], axis=-1)

    ref = reference_fft(x, H, W_sp, complex_weight, ws)

    # --- exact f32 path: folded operator is mathematically identical ---
    k_f32 = build_wfm_operator(complex_weight, ws, pack=2, dtype=jnp.float32)
    out_f32 = window_frequency_modulation(
        x, k_f32, H=H, W=W_sp, window_size=ws, pack=2,
        compute_dtype=jnp.float32)
    out_f32 = jax.block_until_ready(out_f32)
    np.testing.assert_allclose(np.asarray(out_f32), np.asarray(ref),
                               rtol=1e-4, atol=1e-4)

    # --- bf16 fast path (default): bf16 streaming + bf16 kernel output,
    #     f32 accumulation, f32 cast fused into the inverse relayout ---
    k_bf16 = build_wfm_operator(complex_weight, ws, pack=2, dtype=jnp.bfloat16)
    out_bf16 = window_frequency_modulation(
        x, k_bf16, H=H, W=W_sp, window_size=ws, pack=2,
        compute_dtype=jnp.bfloat16)
    out_bf16 = jax.block_until_ready(out_bf16)
    np.testing.assert_allclose(np.asarray(out_bf16), np.asarray(ref),
                               rtol=3e-2, atol=3e-2)

    print("KERNEL_OK")
</pallas_src>

<mosaic_0001>
module attributes {stable_mosaic.version = 11 : i64} {
  func.func @_wfm_kernel(%arg0: i32, %arg1: i32, %arg2: memref<1x8x128xf32, #tpu.memory_space<vmem>>, %arg3: memref<1x128x128xf32, #tpu.memory_space<vmem>>, %arg4: memref<1x8x128xf32, #tpu.memory_space<vmem>>) attributes {dimension_semantics = [#tpu.dimension_semantics<parallel>, #tpu.dimension_semantics<parallel>], iteration_bounds = array<i64: 2, 1>, scalar_prefetch = 0 : i64, scratch_operands = 0 : i64, tpu.core_type = #tpu.core_type<tc>, window_params = [{transform_indices = @transform_0, window_bounds = array<i64: 1, 8, 128>}, {transform_indices = @transform_1, window_bounds = array<i64: 1, 128, 128>}, {transform_indices = @transform_2, window_bounds = array<i64: 1, 8, 128>}]} {
    %c0 = arith.constant 0 : index
    %c0_0 = arith.constant 0 : index
    %c0_1 = arith.constant 0 : index
    %0 = vector.load %arg2[%c0, %c0_0, %c0_1] : memref<1x8x128xf32, #tpu.memory_space<vmem>>, vector<1x8x128xf32>
    %1 = vector.shape_cast %0 : vector<1x8x128xf32> to vector<8x128xf32>
    %c0_2 = arith.constant 0 : index
    %c0_3 = arith.constant 0 : index
    %c0_4 = arith.constant 0 : index
    %2 = vector.load %arg3[%c0_2, %c0_3, %c0_4] : memref<1x128x128xf32, #tpu.memory_space<vmem>>, vector<1x128x128xf32>
    %3 = vector.shape_cast %2 : vector<1x128x128xf32> to vector<128x128xf32>
    %cst = arith.constant dense<0.000000e+00> : vector<8x128xf32>
    %4 = tpu.matmul %1, %3, %cst {dimension_numbers = #tpu.dot_dimension_numbers<[1], [0], [0], [1], [0, 0, 1, 1], [], []>} : vector<8x128xf32>, vector<128x128xf32>, vector<8x128xf32> -> vector<8x128xf32>
    %c0_5 = arith.constant 0 : index
    %c0_6 = arith.constant 0 : index
    %c0_7 = arith.constant 0 : index
    %5 = vector.load %arg4[%c0_5, %c0_6, %c0_7] : memref<1x8x128xf32, #tpu.memory_space<vmem>>, vector<1x8x128xf32>
    %6 = vector.shape_cast %5 : vector<1x8x128xf32> to vector<8x128xf32>
    %7 = vector.shape_cast %4 : vector<8x128xf32> to vector<1x8x128xf32>
    tpu.vector_store %arg4[%c0_5, %c0_6, %c0_7], %7 {strides = array<i32>} : memref<1x8x128xf32, #tpu.memory_space<vmem>>, vector<1x8x128xf32>,
    return
  }
  func.func @transform_0(%arg0: i32, %arg1: i32) -> (i32, i32, i32) {
    %c0_i32 = arith.constant 0 : i32
    %c0_i32_0 = arith.constant 0 : i32
    return %arg0, %arg1, %c0_i32 : i32, i32, i32
  }
  func.func @transform_1(%arg0: i32, %arg1: i32) -> (i32, i32, i32) {
    %c0_i32 = arith.constant 0 : i32
    %c0_i32_0 = arith.constant 0 : i32
    %c0_i32_1 = arith.constant 0 : i32
    return %arg0, %c0_i32, %c0_i32_0 : i32, i32, i32
  }
  func.func @transform_2(%arg0: i32, %arg1: i32) -> (i32, i32, i32) {
    %c0_i32 = arith.constant 0 : i32
    %c0_i32_0 = arith.constant 0 : i32
    return %arg0, %arg1, %c0_i32 : i32, i32, i32
  }
}

</mosaic_0001>

<bundles_post_ra>
// kernel: window_frequency_modulation.1
= control target key start
LH: loop header
LB: loop body
LE: loop exit
PB: predicated region body
PF: predicated region fallthrough
CT: control target
= control target key end

     0   :  { %s495_s9 = smov 0   ;;  %s497_s10 = smov 0   ;;  %s553_s0 = inlined_call_operand.vmem [shape: f32[2,8,128], index: 0, kind: input, shape index: {}]   ;;  %s554_s1 = inlined_call_operand.vmem [shape: f32[2,128,128], index: 1, kind: input, shape index: {}]   ;;  %s555_s2 = inlined_call_operand.vmem [shape: f32[2,8,128], index: 2, kind: output, shape index: {}]  }
   0x1   :  { %s499_s11 = smov 0  }
   0x2 LB: > { %s24_s12 = sadd.s32 1, %s472_s10  ;;  %p368_p0 = scmp.ge.s32.totalorder %s476_s11, 1  ;;  %s476_s11 = sphi %s499_s11, %s12_s11   ;;  %s472_s10 = sphi %s497_s10, %s557_s10   ;;  %s468_s9 = sphi %s495_s9, %s556_s9  }
   0x3   : > { %p26_p1 = scmp.ge.s32.totalorder %s24_s12, 2  ;;  %p140_p2 = scmp.lt.s32.totalorder %s476_s11, 3 }
   0x5   : > { %s559_s12 = smov (%p26_p1, %s24_s12), 0  ;;  %p141_p3 = pnand %p368_p0, %p140_p2 }
   0x6   : > { %p171_p4 = scmp.lt.s32.totalorder (!%p141_p3), %s468_s9, 1 }
   0x7   : > { %144 = sbr.rel (%p141_p3) target bundleno = 242 (0xf2), region = 28 }
   0xc   : > { %v478_v0 = vmov 0.0   ;;  %vm479_vm0 = vmmov 0   ;;  %s561_s9 = smov (!%p171_p4, %s468_s9), 1 }
   0xd   : > { %393 = vmatprep.subr.mxu0 %v478_v0  ;;  %425 = vmatprep.mubr.msk.f32.mxu0 %vm479_vm0, %v478_v0  ;;  %s375_s13 = sshll.u32 %s561_s9, 7  ;;  %s369_s17 = sshll.u32 %s561_s9, 3 }
   0xe   : > { %s519_s16 = scalar_lea.vmem %s554_s1, %s375_s13  ;;  %s177_s20 = scalar_lea.vmem %s553_s0, %s369_s17 }
   0xf   : > { %v206_v1 = vld [vmem:[%s519_s16 + $0x78] sm:$0xff]  ;;  %v205_v2 = vld [vmem:[%s519_s16 + $0x70] sm:$0xff]  ;;  %v204_v3 = vld [vmem:[%s519_s16 + $0x68] sm:$0xff]  ;;  %s189_s23 = scalar_lea.vmem %s555_s2, %s369_s17 }
  0x10   : > { %394 = vmatpush3.msra.mxu0 %v206_v1  ;;  %v203_v4 = vld [vmem:[%s519_s16 + $0x60] sm:$0xff]  ;;  %v202_v5 = vld [vmem:[%s519_s16 + $0x58] sm:$0xff]  ;;  %v201_v6 = vld [vmem:[%s519_s16 + $0x50] sm:$0xff] }
  0x11   : > { %395 = vmatprep.subr.mxu0 %v478_v0  ;;  %v200_v7 = vld [vmem:[%s519_s16 + $0x48] sm:$0xff]  ;;  %v199_v8 = vld [vmem:[%s519_s16 + $0x40] sm:$0xff]  ;;  %v198_v9 = vld [vmem:[%s519_s16 + $0x38] sm:$0xff] }
  0x12   : > { %396 = vmatpush3.msra.mxu0 %v205_v2  ;;  %v197_v10 = vld [vmem:[%s519_s16 + $0x30] sm:$0xff]  ;;  %v196_v11 = vld [vmem:[%s519_s16 + $0x28] sm:$0xff]  ;;  %v195_v12 = vld [vmem:[%s519_s16 + $0x20] sm:$0xff] }
  0x13   : > { %397 = vmatprep.subr.mxu0 %v478_v0  ;;  %v194_v13 = vld [vmem:[%s519_s16 + $0x18] sm:$0xff]  ;;  %v193_v14 = vld [vmem:[%s519_s16 + $0x10] sm:$0xff]  ;;  %v192_v15 = vld [vmem:[%s519_s16 + $0x8] sm:$0xff] }
  0x14   : > { %398 = vmatpush3.msra.mxu0 %v204_v3  ;;  %v191_v16 = vld [vmem:[%s519_s16] sm:$0xff] }
  0x15   : > { %399 = vmatprep.subr.mxu0 %v478_v0  ;;  %v190_v17 = vld [vmem:[%s177_s20] sm:$0xff] }
  0x16   : > { %400 = vmatpush3.msra.mxu0 %v203_v4 }
  0x17   : > { %401 = vmatprep.subr.mxu0 %v478_v0 }
  0x18   : > { %402 = vmatpush3.msra.mxu0 %v202_v5 }
  0x19   : > { %403 = vmatprep.subr.mxu0 %v478_v0 }
  0x1a   : > { %404 = vmatpush3.msra.mxu0 %v201_v6 }
  0x1b   : > { %405 = vmatprep.subr.mxu0 %v478_v0 }
  0x1c   : > { %406 = vmatpush3.msra.mxu0 %v200_v7 }
  0x1d   : > { %407 = vmatprep.subr.mxu0 %v478_v0 }
  0x1e   : > { %408 = vmatpush3.msra.mxu0 %v199_v8 }
  0x1f   : > { %409 = vmatprep.subr.mxu0 %v478_v0 }
  0x20   : > { %410 = vmatpush3.msra.mxu0 %v198_v9 }
  0x21   : > { %411 = vmatprep.subr.mxu0 %v478_v0 }
  0x22   : > { %412 = vmatpush3.msra.mxu0 %v197_v10 }
  0x23   : > { %413 = vmatprep.subr.mxu0 %v478_v0 }
  0x24   : > { %414 = vmatpush3.msra.mxu0 %v196_v11 }
  0x25   : > { %415 = vmatprep.subr.mxu0 %v478_v0 }
  0x26   : > { %416 = vmatpush3.msra.mxu0 %v195_v12 }
  0x27   : > { %417 = vmatprep.subr.mxu0 %v478_v0 }
  0x28   : > { %418 = vmatpush3.msra.mxu0 %v194_v13 }
  0x29   : > { %419 = vmatprep.subr.mxu0 %v478_v0 }
  0x2a   : > { %420 = vmatpush3.msra.mxu0 %v193_v14 }
  0x2b   : > { %421 = vmatprep.subr.mxu0 %v478_v0 }
  0x2c   : > { %422 = vmatpush3.msra.mxu0 %v192_v15 }
  0x2d   : > { %423 = vmatprep.subr.mxu0 %v478_v0 }
  0x2e   : > { %424 = vmatpush3.msra.mxu0 %v191_v16 }
  0x2f   : > { %426 = vmatmul.mubr.f32.vlgmr.msra.gmra.mxu0 %v190_v17 }
  0xef   : > { %v273_v18 = vpop.f32.mrf.mxu0 }
  0xf0   : > { %277 = vst [vmem:[%s189_s23] sm:$0xff] %v273_v18 }
  0xf1   : > { %v427_v19 = vpop.f32.mrf.mxu0 }
  0xf2 PF: > { %s12_s11 = sadd.s32 1, %s476_s11   ;;  %s556_s9 = smov %s472_s10 }
  0xf3   : > { %p9_p5 = scmp.ge.s32.totalorder %s12_s11, 4   ;;  %s557_s10 = smov %s559_s12 }
  0xf5   :  { %11 = sbr.rel (!%p9_p5) target bundleno = 2 (0x2), region = 61 }

</bundles_post_ra>
